<compile_context>
chip_gen: v5e
topology: v5e:2x2
jax: 0.10.0
libtpu: 0.0.40
codegen_flags: <defaults>
</compile_context>

<pallas_src>
import functools

import jax
import jax.numpy as jnp
from jax.experimental import pallas as pl
from jax.experimental.pallas import tpu as pltpu


# ---------------------------------------------------------------------------
# Pallas kernel
# ---------------------------------------------------------------------------
def _soft_ce_kernel(x_ref, t_ref, o_ref):
    # x_ref, t_ref : (TN, C)   logits / soft targets
    # o_ref        : (TN, 1)   per-row loss
    x = x_ref[...].astype(jnp.float32)
    t = t_ref[...].astype(jnp.float32)

    # row-wise logsumexp (numerically stable)
    m = jnp.max(x, axis=-1, keepdims=True)
    lse = m + jnp.log(jnp.sum(jnp.exp(x - m), axis=-1, keepdims=True))

    # loss = -sum(t * (x - lse)) = sum(t)*lse - sum(t*x)
    t_sum = jnp.sum(t, axis=-1, keepdims=True)
    tx_sum = jnp.sum(t * x, axis=-1, keepdims=True)
    o_ref[...] = t_sum * lse - tx_sum


# ---------------------------------------------------------------------------
# Wrapper
# ---------------------------------------------------------------------------
@functools.partial(jax.jit, static_argnames=("block_rows",))
def soft_target_cross_entropy(x, target, *, block_rows=256):
    """x, target: (..., C). Returns per-sample loss of shape (...)."""
    orig_lead = x.shape[:-1]
    C = x.shape[-1]
    N = 1
    for d in orig_lead:
        N *= d

    x2 = x.reshape(N, C)
    t2 = target.reshape(N, C)

    # Row tile: multiple of 8, capped so one input tile is ~<= 4 MiB.
    if N <= 8:
        tn = N                              # single full block (always legal)
    else:
        vmem_cap_rows = max(8, (4 << 20) // max(1, 4 * C))
        tn = min(block_rows, vmem_cap_rows, N)
        tn = max(8, (tn // 8) * 8)
    n_p = ((N + tn - 1) // tn) * tn

    if n_p != N:
        pad = n_p - N
        x2 = jnp.concatenate([x2, jnp.zeros((pad, C), x2.dtype)], axis=0)
        t2 = jnp.concatenate([t2, jnp.zeros((pad, C), t2.dtype)], axis=0)

    out = pl.pallas_call(
        _soft_ce_kernel,
        out_shape=jax.ShapeDtypeStruct((n_p, 1), jnp.float32),
        grid=(n_p // tn,),
        in_specs=[
            pl.BlockSpec((tn, C), lambda i: (i, 0)),
            pl.BlockSpec((tn, C), lambda i: (i, 0)),
        ],
        out_specs=pl.BlockSpec((tn, 1), lambda i: (i, 0)),
        compiler_params=pltpu.CompilerParams(
            dimension_semantics=("parallel",)),
    )(x2, t2)

    loss = out[:N, 0].reshape(orig_lead)
    return loss.astype(x.dtype)


# ---------------------------------------------------------------------------
if __name__ == "__main__":
    key = jax.random.PRNGKey(0)
    kx, kt = jax.random.split(key)

    N, C = 8, 32
    x = jax.random.normal(kx, (N, C), dtype=jnp.float32)
    # soft targets (rows sum to 1, like mixup/label-smoothing targets)
    target = jax.nn.softmax(jax.random.normal(kt, (N, C), dtype=jnp.float32),
                            axis=-1)

    loss = soft_target_cross_entropy(x, target)
    jax.block_until_ready(loss)

    # pure-JAX reference check
    ref = jnp.sum(-target * jax.nn.log_softmax(x, axis=-1), axis=-1)
    assert loss.shape == (N,)
    assert jnp.allclose(loss, ref, atol=1e-5, rtol=1e-5), (loss, ref)

    print("KERNEL_OK")
</pallas_src>

<mosaic_0001>
module attributes {stable_mosaic.version = 11 : i64} {
  func.func @_soft_ce_kernel(%arg0: i32, %arg1: memref<8x32xf32, #tpu.memory_space<vmem>>, %arg2: memref<8x32xf32, #tpu.memory_space<vmem>>, %arg3: memref<8x1xf32, #tpu.memory_space<vmem>>) attributes {dimension_semantics = [#tpu.dimension_semantics<parallel>], iteration_bounds = array<i64: 1>, scalar_prefetch = 0 : i64, scratch_operands = 0 : i64, tpu.core_type = #tpu.core_type<tc>, window_params = [{transform_indices = @transform_0, window_bounds = array<i64: 8, 32>}, {transform_indices = @transform_1, window_bounds = array<i64: 8, 32>}, {transform_indices = @transform_2, window_bounds = array<i64: 8, 1>}]} {
    %c0 = arith.constant 0 : index
    %c0_0 = arith.constant 0 : index
    %0 = vector.load %arg1[%c0, %c0_0] : memref<8x32xf32, #tpu.memory_space<vmem>>, vector<8x32xf32>
    %c0_1 = arith.constant 0 : index
    %c0_2 = arith.constant 0 : index
    %1 = vector.load %arg2[%c0_1, %c0_2] : memref<8x32xf32, #tpu.memory_space<vmem>>, vector<8x32xf32>
    %cst = arith.constant dense<0xFF800000> : vector<8xf32>
    %2 = vector.multi_reduction <maximumf>, %0, %cst [1] : vector<8x32xf32> to vector<8xf32>
    %3 = vector.shape_cast %2 : vector<8xf32> to vector<8x1xf32>
    %4 = vector.broadcast %3 : vector<8x1xf32> to vector<8x32xf32>
    %5 = arith.subf %0, %4 : vector<8x32xf32>
    %6 = math.exp %5 : vector<8x32xf32>
    %cst_3 = arith.constant dense<0.000000e+00> : vector<8xf32>
    %7 = vector.multi_reduction <add>, %6, %cst_3 [1] : vector<8x32xf32> to vector<8xf32>
    %8 = vector.shape_cast %7 : vector<8xf32> to vector<8x1xf32>
    %9 = math.log %8 : vector<8x1xf32>
    %10 = arith.addf %3, %9 : vector<8x1xf32>
    %cst_4 = arith.constant dense<0.000000e+00> : vector<8xf32>
    %11 = vector.multi_reduction <add>, %1, %cst_4 [1] : vector<8x32xf32> to vector<8xf32>
    %12 = vector.shape_cast %11 : vector<8xf32> to vector<8x1xf32>
    %13 = arith.mulf %1, %0 : vector<8x32xf32>
    %cst_5 = arith.constant dense<0.000000e+00> : vector<8xf32>
    %14 = vector.multi_reduction <add>, %13, %cst_5 [1] : vector<8x32xf32> to vector<8xf32>
    %15 = vector.shape_cast %14 : vector<8xf32> to vector<8x1xf32>
    %16 = arith.mulf %12, %10 : vector<8x1xf32>
    %17 = arith.subf %16, %15 : vector<8x1xf32>
    %c0_6 = arith.constant 0 : index
    %c0_7 = arith.constant 0 : index
    %18 = vector.load %arg3[%c0_6, %c0_7] : memref<8x1xf32, #tpu.memory_space<vmem>>, vector<8x1xf32>
    tpu.vector_store %arg3[%c0_6, %c0_7], %17 {strides = array<i32>} : memref<8x1xf32, #tpu.memory_space<vmem>>, vector<8x1xf32>,
    return
  }
  func.func @transform_0(%arg0: i32) -> (i32, i32) {
    %c0_i32 = arith.constant 0 : i32
    %c0_i32_0 = arith.constant 0 : i32
    return %arg0, %c0_i32 : i32, i32
  }
  func.func @transform_1(%arg0: i32) -> (i32, i32) {
    %c0_i32 = arith.constant 0 : i32
    %c0_i32_0 = arith.constant 0 : i32
    return %arg0, %c0_i32 : i32, i32
  }
  func.func @transform_2(%arg0: i32) -> (i32, i32) {
    %c0_i32 = arith.constant 0 : i32
    %c0_i32_0 = arith.constant 0 : i32
    return %arg0, %c0_i32 : i32, i32
  }
}

</mosaic_0001>

<bundles_post_ra>
// kernel: soft_target_cross_entropy.1
= control target key start
LH: loop header
LB: loop body
LE: loop exit
PB: predicated region body
PF: predicated region fallthrough
CT: control target
= control target key end

     0   :  { %7 = vsyncpa [#allocation3], 0  ;;  %s155_s0 = inlined_call_operand.hbm [shape: f32[8,32], index: 0, kind: input, shape index: {}]   ;;  %s156_s1 = inlined_call_operand.hbm [shape: f32[8,32], index: 1, kind: input, shape index: {}]   ;;  %s157_s2 = inlined_call_operand.vmem [shape: f32[8,1], index: 2, kind: output, shape index: {}]  }
   0x1   :  { %s14_s11 = sshll.u32 %s155_s0, 4  ;;  %s15_s11 = int_to_ptr.hbm [resolvable:$true] %s14_s11 }
   0x2   :  { %8 = vsyncpa [#allocation5], 0  ;;  %s129_s12 = smov [#allocation2]   ;;  %s25_s16 = sshll.u32 %s156_s1, 4  ;;  %s26_s16 = int_to_ptr.hbm [resolvable:$true] %s25_s16 }
   0x3   :  { %s16_s13 = sshll.u32 %s129_s12, 4  ;;  %s130_s17 = smov [#allocation4]   ;;  %s17_s13 = int_to_ptr.vmem [resolvable:$true] %s16_s13 }
   0x4   :  { %19 = dma.hbm_to_vmem [thread:$0]  %s15_s11, 128, %s17_s13, [#allocation3]  }
   0x5   :  { %s27_s18 = sshll.u32 %s130_s17, 4  ;;  %s28_s18 = int_to_ptr.vmem [resolvable:$true] %s27_s18 }
   0x6   :  { %30 = dma.hbm_to_vmem [thread:$0]  %s26_s16, 128, %s28_s18, [#allocation5]  }
   0x7   :  { %125 = dma.done.wait [#allocation3], 128  }
   0x8   :  { %126 = vsyncadd [#allocation3], 4294967168 }
   0x9   :  { %127 = dma.done.wait [#allocation5], 128  }
   0xa   :  { %128 = vsyncadd [#allocation5], 4294967168  ;;  %vm41_vm0 = vcmask 261120   ;;  %v39_v0 = vld [vmem:[#allocation2] sm:$0xff]  ;;  %v40_v2 = vld [vmem:[#allocation4] sm:$0xff]  ;;  %vm63_vm1 = vcmask 7168  }
   0xb   :  { %v42_v1 = vsel %vm41_vm0, %v39_v0, -inf  ;;  %v54_v3 = vsel %vm41_vm0, %v40_v2, 0.0  ;;  %v57_v4 = vmul.f32 %v40_v2, %v39_v0 }
   0xc   :  { %43 = vmax.xlane.f32.xlu0 %v42_v1  ;;  %55 = vadd.xlane.f32.xlu1 %v54_v3 }
   0xd   :  { %v58_v5 = vsel %vm41_vm0, %v57_v4, 0.0 }
  0x14   :  { %59 = vadd.xlane.f32.xlu1 %v58_v5 }
  0x7f   :  { %v44_v6 = vpop.xlane.xlu0 %43  ;;  %v56_v12 = vpop.xlane.xlu1 %55 }
  0x80   :  { %v45_v7 = vsub.f32 %v39_v0, %v44_v6 }
  0x82   :  { %v46_v8 = vmul.f32 1.442695, %v45_v7 }
  0x84   :  { %73 = vpow2.f32 %v46_v8 }
  0x87   :  { %v60_v16 = vpop.xlane.xlu1 %59 }
  0x8a   :  { %v74_v9 = vpop.eup %73 }
  0x8b   :  { %v48_v10 = vsel %vm41_vm0, %v74_v9, 0.0 }
  0x8c   :  { %49 = vadd.xlane.f32.xlu0 %v48_v10 }
  0xff   :  { %v50_v11 = vpop.xlane.xlu0 %49 }
 0x100   :  { %75 = vlog2.f32 %v50_v11 }
 0x106   :  { %v76_v13 = vpop.eup %75 }
 0x107   :  { %v52_v14 = vmul.f32 0.6931472, %v76_v13 }
 0x109   :  { %v53_v15 = vadd.f32 %v52_v14, %v44_v6 }
 0x10b   :  { %v61_v17 = vmul.f32 %v56_v12, %v53_v15 }
 0x10d   :  { %v62_v18 = vsub.f32 %v61_v17, %v60_v16 }
 0x10f   :  { %64 = vst.msk [vmem:[%s157_s2] sm:$0xff] %vm63_vm1, %v62_v18 }
 0x110   :  { %69 = vsyncpa [#allocation3], 1 }
 0x111   :  { %70 = vsyncpa [#allocation5], 1 }

</bundles_post_ra>
